<compile_context>
chip_gen: v6e
topology: v6e:2x2x1
jax: 0.10.0
libtpu: 0.0.40
codegen_flags: <defaults>
</compile_context>

<pallas_src>
import numpy as np
import jax
import jax.numpy as jnp
from jax.experimental import pallas as pl
from jax.experimental.pallas import tpu as pltpu


def _choose_t_tile(b_chunk, t_mel, lanes, itemsize):
    """Largest mel T tile (multiple of 128, or full axis) keeping double-buffered mel blocks small."""
    budget = 20 * 1024 * 1024  # bytes for 3 mel tensors x 2 pipeline buffers
    for t in (2048, 1024, 512, 256, 128):
        if t_mel >= t and 3 * 2 * b_chunk * t * lanes * itemsize <= budget:
            return t
    if t_mel > 128:
        return 128
    return t_mel  # full axis is always a legal block dim


def _make_kernel(t_mel_total, t_tile):
    f32 = jnp.float32
    needs_tail_guard = (t_mel_total % t_tile) != 0  # statically compile out guard when divisible

    def kernel(mel_p_ref, post_p_ref, mel_t_ref, mel_m_ref,
               pitch_p_ref, pitch_t_ref, pitch_m_ref,
               energy_p_ref, energy_t_ref, energy_m_ref,
               logdur_p_ref, dur_t_ref, src_m_ref,
               mu_ref, logvar_ref,
               o_ref, acc_ref):
        t = pl.program_id(1)

        # ---- init accumulators + small-tensor sums (once per batch chunk) ----
        @pl.when(t == 0)
        def _init():
            acc_ref[0] = 0.0          # sum |mel_pred - mel_tgt| on valid frames
            acc_ref[1] = 0.0          # sum |postnet  - mel_tgt| on valid frames
            acc_ref[2] = 0.0          # valid mel frame count

            # pitch MSE sums
            pm = pitch_m_ref[...].astype(f32)
            pd = pitch_p_ref[...].astype(f32) - pitch_t_ref[...].astype(f32)
            acc_ref[3] = jnp.sum(pd * pd * pm)
            acc_ref[4] = jnp.sum(pm)

            # energy MSE sums
            em = energy_m_ref[...].astype(f32)
            ed = energy_p_ref[...].astype(f32) - energy_t_ref[...].astype(f32)
            acc_ref[5] = jnp.sum(ed * ed * em)
            acc_ref[6] = jnp.sum(em)

            # duration MSE sums (log(dur + 1) target computed in-kernel)
            sm = src_m_ref[...].astype(f32)
            log_dur_t = jnp.log(dur_t_ref[...].astype(f32) + 1.0)
            dd = logdur_p_ref[...].astype(f32) - log_dur_t
            acc_ref[7] = jnp.sum(dd * dd * sm)
            acc_ref[8] = jnp.sum(sm)

            # KL term: -0.5 * sum(1 + logvar - mu^2 - exp(logvar))
            mu = mu_ref[...].astype(f32)
            lv = logvar_ref[...].astype(f32)
            acc_ref[9] = -0.5 * jnp.sum(1.0 + lv - mu * mu - jnp.exp(lv))

        # ---- masked mel L1 partial sums for this T tile ----
        m = mel_m_ref[...].astype(f32)                 # (Bc, Tt), 1.0 = valid
        if needs_tail_guard:
            bc, tt = mel_m_ref.shape
            t_ids = jax.lax.broadcasted_iota(jnp.int32, (bc, tt), 1) + t * t_tile
            m = jnp.where(t_ids < t_mel_total, m, 0.0)  # tail-tile guard (OOB block padding)
        m3 = m[:, :, None]
        valid3 = m3 > 0.0

        mt = mel_t_ref[...].astype(f32)
        d_mel = jnp.where(valid3, jnp.abs(mel_p_ref[...].astype(f32) - mt), 0.0)
        d_post = jnp.where(valid3, jnp.abs(post_p_ref[...].astype(f32) - mt), 0.0)

        acc_ref[0] += jnp.sum(d_mel)
        acc_ref[1] += jnp.sum(d_post)
        acc_ref[2] += jnp.sum(m)

        # ---- flush to output only on the last T tile of this batch chunk ----
        @pl.when(t == pl.num_programs(1) - 1)
        def _flush():
            for i in range(10):
                o_ref[0, i] = acc_ref[i]

    return kernel


def _loss_sums(mel_p, post_p, mel_t, mel_m,
               pitch_p, pitch_t, pitch_m,
               energy_p, energy_t, energy_m,
               logdur_p, dur_t, src_m,
               mu, logvar):
    B, T_mel, M = mel_t.shape

    # 2-way batch split for multi-TensorCore chips, only when per-chunk batch keeps tiling legal.
    NB = 2 if (B % 2 == 0 and (B // 2) % 8 == 0) else 1
    Bc = B // NB

    lanes = ((M + 127) // 128) * 128
    itemsize = max(mel_p.dtype.itemsize, post_p.dtype.itemsize, mel_t.dtype.itemsize)
    T_TILE = _choose_t_tile(Bc, T_mel, lanes, itemsize)
    NT = pl.cdiv(T_mel, T_TILE)

    mel_map = lambda b, t: (b, t, 0)
    mask_map = lambda b, t: (b, t)
    small_map = lambda b, t: (b, 0)          # resident per batch chunk; no re-DMA along T

    in_specs = [
        pl.BlockSpec((Bc, T_TILE, M), mel_map),
        pl.BlockSpec((Bc, T_TILE, M), mel_map),
        pl.BlockSpec((Bc, T_TILE, M), mel_map),
        pl.BlockSpec((Bc, T_TILE), mask_map),
        pl.BlockSpec((Bc, pitch_p.shape[1]), small_map),
        pl.BlockSpec((Bc, pitch_t.shape[1]), small_map),
        pl.BlockSpec((Bc, pitch_m.shape[1]), small_map),
        pl.BlockSpec((Bc, energy_p.shape[1]), small_map),
        pl.BlockSpec((Bc, energy_t.shape[1]), small_map),
        pl.BlockSpec((Bc, energy_m.shape[1]), small_map),
        pl.BlockSpec((Bc, logdur_p.shape[1]), small_map),
        pl.BlockSpec((Bc, dur_t.shape[1]), small_map),
        pl.BlockSpec((Bc, src_m.shape[1]), small_map),
        pl.BlockSpec((Bc, mu.shape[1]), small_map),
        pl.BlockSpec((Bc, logvar.shape[1]), small_map),
    ]
    out_spec = pl.BlockSpec((1, 10), lambda b, t: (b, 0),
                            memory_space=pltpu.MemorySpace.SMEM)

    sums = pl.pallas_call(
        _make_kernel(T_mel, T_TILE),
        out_shape=jax.ShapeDtypeStruct((NB, 10), jnp.float32),
        grid_spec=pltpu.PrefetchScalarGridSpec(
            num_scalar_prefetch=0,
            grid=(NB, NT),
            in_specs=in_specs,
            out_specs=out_spec,
            scratch_shapes=[pltpu.SMEM((10,), jnp.float32)],
        ),
        compiler_params=pltpu.CompilerParams(
            dimension_semantics=("parallel", "arbitrary"),
            vmem_limit_bytes=32 * 1024 * 1024,
        ),
    )(mel_p, post_p, mel_t, mel_m,
      pitch_p, pitch_t, pitch_m,
      energy_p, energy_t, energy_m,
      logdur_p, dur_t, src_m,
      mu, logvar)

    return jnp.sum(sums, axis=0)   # (10,)


class FastSpeech2wVAELoss:
    """FastSpeech2 + VAE loss, Pallas TPU implementation of the PyTorch module."""

    def __init__(self, pitch_feature_level, energy_feature_level, anneal_function,
                 anneal_lag, anneal_k, anneal_x0, anneal_upper):
        self.pitch_feature_level = 'phoneme_level' if pitch_feature_level > 0 else 'frame_level'
        self.energy_feature_level = 'phoneme_level' if energy_feature_level > 0 else 'frame_level'
        self.anneal_function = anneal_function
        self.lag = anneal_lag
        self.k = anneal_k
        self.x0 = anneal_x0
        self.upper = anneal_upper
        self.step = 0

    def kl_anneal_function(self):
        # Host-side scheduling, identical to the PyTorch module.
        self.step += 1
        if self.anneal_function == 'logistic':
            return float(self.upper / (self.upper + np.exp(-self.k * (self.step - self.x0))))
        elif self.anneal_function == 'linear':
            if self.step > self.lag:
                return min(self.upper, self.step / self.x0)
            else:
                return 0
        elif self.anneal_function == 'constant':
            return 0.001

    def __call__(self, inputs, predictions):
        mel_targets, _, _, pitch_targets, energy_targets, duration_targets = inputs[-6:]
        (mel_predictions, postnet_mel_predictions, pitch_predictions, energy_predictions,
         log_duration_predictions, _, src_masks, mel_masks, _, _, mu, logvar) = predictions

        T_mel = mel_masks.shape[1]
        mel_targets = mel_targets[:, :T_mel, :]
        mel_predictions = mel_predictions[:, :T_mel, :]
        postnet_mel_predictions = postnet_mel_predictions[:, :T_mel, :]

        # ~mask: 1.0 = valid position (tiny (B, T) float arrays)
        src_valid = jnp.logical_not(src_masks).astype(jnp.float32)
        mel_valid = jnp.logical_not(mel_masks).astype(jnp.float32)
        pitch_mask = src_valid if self.pitch_feature_level == 'phoneme_level' else mel_valid
        energy_mask = src_valid if self.energy_feature_level == 'phoneme_level' else mel_valid

        # NOTE: no .astype(float32) on the large tensors — native (e.g. bf16) dtypes are passed
        # straight to the kernel and cast in-registers.
        sums = _loss_sums(
            mel_predictions, postnet_mel_predictions, mel_targets, mel_valid,
            pitch_predictions, pitch_targets, pitch_mask,
            energy_predictions, energy_targets, energy_mask,
            log_duration_predictions, duration_targets, src_valid,
            mu, logvar,
        )

        n_mels = mel_targets.shape[-1]
        mel_denom = sums[2] * n_mels
        mel_loss = sums[0] / mel_denom
        postnet_mel_loss = sums[1] / mel_denom
        pitch_loss = sums[3] / sums[4]
        energy_loss = sums[5] / sums[6]
        duration_loss = sums[7] / sums[8]
        kl_loss = sums[9]

        kl_weight = self.kl_anneal_function()
        total_loss = (mel_loss + postnet_mel_loss + duration_loss
                      + pitch_loss + energy_loss + kl_weight * kl_loss)

        # JAX scalars (single device result) — no per-loss host syncs here.
        loss_values = {
            'mel_loss': mel_loss,
            'postnet_mel_loss': postnet_mel_loss,
            'pitch_loss': pitch_loss,
            'energy_loss': energy_loss,
            'duration_loss': duration_loss,
            'kl_loss': kl_loss,
            'total_loss': total_loss,
        }
        return total_loss, loss_values


def _reference_losses(inputs, predictions, pitch_level, energy_level):
    """Pure-JAX reference (masked weighted means) for correctness check."""
    mel_t, _, _, pitch_t, energy_t, dur_t = inputs[-6:]
    (mel_p, post_p, pitch_p, energy_p, logdur_p, _, src_masks, mel_masks, _, _, mu, logvar) = predictions
    sv = jnp.logical_not(src_masks)
    mv = jnp.logical_not(mel_masks)
    mel_t = mel_t[:, :mel_masks.shape[1], :].astype(jnp.float32)
    mel_p = mel_p[:, :mel_masks.shape[1], :].astype(jnp.float32)
    post_p = post_p[:, :mel_masks.shape[1], :].astype(jnp.float32)

    def masked_mean(x, m):
        m = m.astype(jnp.float32)
        return jnp.sum(x * m) / jnp.sum(m)

    mv3 = mv[:, :, None].astype(jnp.float32)
    denom = jnp.sum(mv.astype(jnp.float32)) * mel_t.shape[-1]
    mel_loss = jnp.sum(jnp.abs(mel_p - mel_t) * mv3) / denom
    post_loss = jnp.sum(jnp.abs(post_p - mel_t) * mv3) / denom
    pm = sv if pitch_level == 'phoneme_level' else mv
    em = sv if energy_level == 'phoneme_level' else mv
    pitch_loss = masked_mean((pitch_p.astype(jnp.float32) - pitch_t.astype(jnp.float32)) ** 2, pm)
    energy_loss = masked_mean((energy_p.astype(jnp.float32) - energy_t.astype(jnp.float32)) ** 2, em)
    logdur_t = jnp.log(dur_t.astype(jnp.float32) + 1.0)
    dur_loss = masked_mean((logdur_p.astype(jnp.float32) - logdur_t) ** 2, sv)
    kl = -0.5 * jnp.sum(1.0 + logvar - mu ** 2 - jnp.exp(logvar))
    return mel_loss, post_loss, pitch_loss, energy_loss, dur_loss, kl


def _make_case(key, B, T_src, T_mel, M, Z, src_lens, mel_lens):
    ks = jax.random.split(key, 11)
    mel_targets = jax.random.normal(ks[0], (B, T_mel, M), jnp.float32)
    pitch_targets = jax.random.normal(ks[1], (B, T_src), jnp.float32)      # phoneme-level pitch
    energy_targets = jax.random.normal(ks[2], (B, T_mel), jnp.float32)     # frame-level energy
    duration_targets = jax.random.randint(ks[3], (B, T_src), 0, 10)

    mel_predictions = jax.random.normal(ks[4], (B, T_mel, M), jnp.float32)
    postnet_mel_predictions = jax.random.normal(ks[5], (B, T_mel, M), jnp.float32)
    pitch_predictions = jax.random.normal(ks[6], (B, T_src), jnp.float32)
    energy_predictions = jax.random.normal(ks[7], (B, T_mel), jnp.float32)
    log_duration_predictions = jax.random.normal(ks[8], (B, T_src), jnp.float32)
    mu = 0.1 * jax.random.normal(ks[9], (B, Z), jnp.float32)
    logvar = 0.1 * jax.random.normal(ks[10], (B, Z), jnp.float32)

    # padding masks (True = pad), as produced upstream in FastSpeech2
    src_masks = jnp.arange(T_src)[None, :] >= jnp.asarray(src_lens)[:, None]
    mel_masks = jnp.arange(T_mel)[None, :] >= jnp.asarray(mel_lens)[:, None]

    inputs = (mel_targets, None, None, pitch_targets, energy_targets, duration_targets)
    predictions = (mel_predictions, postnet_mel_predictions, pitch_predictions, energy_predictions,
                   log_duration_predictions, None, src_masks, mel_masks, None, None, mu, logvar)
    return inputs, predictions


if __name__ == "__main__":
    key = jax.random.PRNGKey(0)
    k1, k2 = jax.random.split(key)

    loss_fn = FastSpeech2wVAELoss(
        pitch_feature_level=1,      # phoneme_level
        energy_feature_level=0,     # frame_level
        anneal_function='logistic',
        anneal_lag=1000,
        anneal_k=0.0025,
        anneal_x0=10000,
        anneal_upper=0.2,
    )

    # ---- case 1: small shapes (single full-axis T tile) ----
    inputs, predictions = _make_case(k1, B=2, T_src=8, T_mel=16, M=32, Z=16,
                                     src_lens=[8, 5], mel_lens=[16, 12])
    total_loss, loss_values = loss_fn(inputs, predictions)
    total_loss = jax.block_until_ready(total_loss)

    ref = _reference_losses(inputs, predictions, 'phoneme_level', 'frame_level')
    got = (loss_values['mel_loss'], loss_values['postnet_mel_loss'], loss_values['pitch_loss'],
           loss_values['energy_loss'], loss_values['duration_loss'], loss_values['kl_loss'])
    for r, g in zip(ref, got):
        assert abs(float(r) - float(g)) < 1e-4, (float(r), float(g))

    # ---- case 2: bf16 pass-through smoke test (no wrapper upcast; kernel casts in-registers) ----
    (mel_p, post_p, pitch_p, energy_p, logdur_p, _, src_m, mel_m, _, _, mu, logvar) = predictions
    predictions_bf16 = (mel_p.astype(jnp.bfloat16), post_p.astype(jnp.bfloat16),
                        pitch_p, energy_p, logdur_p, None, src_m, mel_m, None, None, mu, logvar)
    total_bf16, lv_bf16 = loss_fn(inputs, predictions_bf16)
    total_bf16 = jax.block_until_ready(total_bf16)
    assert bool(jnp.isfinite(total_bf16))
    assert abs(float(lv_bf16['mel_loss']) - float(loss_values['mel_loss'])) < 0.1

    # ---- case 3: T_mel not a multiple of the tile (exercises the tail-tile guard path) ----
    inputs3, predictions3 = _make_case(k2, B=2, T_src=13, T_mel=300, M=80, Z=16,
                                       src_lens=[13, 9], mel_lens=[300, 237])
    total3, lv3 = loss_fn(inputs3, predictions3)
    total3 = jax.block_until_ready(total3)
    ref3 = _reference_losses(inputs3, predictions3, 'phoneme_level', 'frame_level')
    got3 = (lv3['mel_loss'], lv3['postnet_mel_loss'], lv3['pitch_loss'],
            lv3['energy_loss'], lv3['duration_loss'], lv3['kl_loss'])
    for r, g in zip(ref3, got3):
        assert abs(float(r) - float(g)) < 2e-4, (float(r), float(g))

    print("KERNEL_OK")
</pallas_src>

<mosaic_0001>
module attributes {stable_mosaic.version = 11 : i64} {
  func.func @kernel(%arg0: i32, %arg1: i32, %arg2: memref<2x16x32xf32, #tpu.memory_space<vmem>>, %arg3: memref<2x16x32xf32, #tpu.memory_space<vmem>>, %arg4: memref<2x16x32xf32, #tpu.memory_space<vmem>>, %arg5: memref<2x16xf32, #tpu.memory_space<vmem>>, %arg6: memref<2x8xf32, #tpu.memory_space<vmem>>, %arg7: memref<2x8xf32, #tpu.memory_space<vmem>>, %arg8: memref<2x8xf32, #tpu.memory_space<vmem>>, %arg9: memref<2x16xf32, #tpu.memory_space<vmem>>, %arg10: memref<2x16xf32, #tpu.memory_space<vmem>>, %arg11: memref<2x16xf32, #tpu.memory_space<vmem>>, %arg12: memref<2x8xf32, #tpu.memory_space<vmem>>, %arg13: memref<2x8xi32, #tpu.memory_space<vmem>>, %arg14: memref<2x8xf32, #tpu.memory_space<vmem>>, %arg15: memref<2x16xf32, #tpu.memory_space<vmem>>, %arg16: memref<2x16xf32, #tpu.memory_space<vmem>>, %arg17: memref<1x10xf32, #tpu.memory_space<smem>>, %arg18: memref<10xf32, #tpu.memory_space<smem>>) attributes {dimension_semantics = [#tpu.dimension_semantics<parallel>, #tpu.dimension_semantics<arbitrary>], iteration_bounds = array<i64: 1, 1>, scalar_prefetch = 0 : i64, scratch_operands = 1 : i64, tpu.core_type = #tpu.core_type<tc>, window_params = [{transform_indices = @transform_0, window_bounds = array<i64: 2, 16, 32>}, {transform_indices = @transform_1, window_bounds = array<i64: 2, 16, 32>}, {transform_indices = @transform_2, window_bounds = array<i64: 2, 16, 32>}, {transform_indices = @transform_3, window_bounds = array<i64: 2, 16>}, {transform_indices = @transform_4, window_bounds = array<i64: 2, 8>}, {transform_indices = @transform_5, window_bounds = array<i64: 2, 8>}, {transform_indices = @transform_6, window_bounds = array<i64: 2, 8>}, {transform_indices = @transform_7, window_bounds = array<i64: 2, 16>}, {transform_indices = @transform_8, window_bounds = array<i64: 2, 16>}, {transform_indices = @transform_9, window_bounds = array<i64: 2, 16>}, {transform_indices = @transform_10, window_bounds = array<i64: 2, 8>}, {transform_indices = @transform_11, window_bounds = array<i64: 2, 8>}, {transform_indices = @transform_12, window_bounds = array<i64: 2, 8>}, {transform_indices = @transform_13, window_bounds = array<i64: 2, 16>}, {transform_indices = @transform_14, window_bounds = array<i64: 2, 16>}, {transform_indices = @transform_15, window_bounds = array<i64: 1, 10>}]} {
    %c0_i32 = arith.constant 0 : i32
    %0 = arith.cmpi eq, %arg1, %c0_i32 : i32
    %1 = arith.extui %0 : i1 to i32
    %c0_i32_0 = arith.constant 0 : i32
    %2 = arith.cmpi ne, %1, %c0_i32_0 : i32
    scf.if %2 {
      %cst_22 = arith.constant 0.000000e+00 : f32
      %c0_23 = arith.constant 0 : index
      %46 = memref.load %arg18[%c0_23] : memref<10xf32, #tpu.memory_space<smem>>
      memref.store %cst_22, %arg18[%c0_23] : memref<10xf32, #tpu.memory_space<smem>>
      %cst_24 = arith.constant 0.000000e+00 : f32
      %c1_25 = arith.constant 1 : index
      %47 = memref.load %arg18[%c1_25] : memref<10xf32, #tpu.memory_space<smem>>
      memref.store %cst_24, %arg18[%c1_25] : memref<10xf32, #tpu.memory_space<smem>>
      %cst_26 = arith.constant 0.000000e+00 : f32
      %c2_27 = arith.constant 2 : index
      %48 = memref.load %arg18[%c2_27] : memref<10xf32, #tpu.memory_space<smem>>
      memref.store %cst_26, %arg18[%c2_27] : memref<10xf32, #tpu.memory_space<smem>>
      %c0_28 = arith.constant 0 : index
      %c0_29 = arith.constant 0 : index
      %49 = vector.load %arg8[%c0_28, %c0_29] : memref<2x8xf32, #tpu.memory_space<vmem>>, vector<2x8xf32>
      %c0_30 = arith.constant 0 : index
      %c0_31 = arith.constant 0 : index
      %50 = vector.load %arg6[%c0_30, %c0_31] : memref<2x8xf32, #tpu.memory_space<vmem>>, vector<2x8xf32>
      %c0_32 = arith.constant 0 : index
      %c0_33 = arith.constant 0 : index
      %51 = vector.load %arg7[%c0_32, %c0_33] : memref<2x8xf32, #tpu.memory_space<vmem>>, vector<2x8xf32>
      %52 = arith.subf %50, %51 : vector<2x8xf32>
      %53 = arith.mulf %52, %52 : vector<2x8xf32>
      %54 = arith.mulf %53, %49 : vector<2x8xf32>
      %55 = vector.shape_cast %54 : vector<2x8xf32> to vector<1x2x8xf32>
      %cst_34 = arith.constant dense<0.000000e+00> : vector<1xf32>
      %56 = vector.multi_reduction <add>, %55, %cst_34 [1, 2] : vector<1x2x8xf32> to vector<1xf32>
      %57 = vector.shape_cast %56 : vector<1xf32> to vector<1x1x1xf32>
      %58 = vector.extract %57[0, 0, 0] : f32 from vector<1x1x1xf32>
      %c3 = arith.constant 3 : index
      %59 = memref.load %arg18[%c3] : memref<10xf32, #tpu.memory_space<smem>>
      memref.store %58, %arg18[%c3] : memref<10xf32, #tpu.memory_space<smem>>
      %60 = vector.shape_cast %49 : vector<2x8xf32> to vector<1x2x8xf32>
      %cst_35 = arith.constant dense<0.000000e+00> : vector<1xf32>
      %61 = vector.multi_reduction <add>, %60, %cst_35 [1, 2] : vector<1x2x8xf32> to vector<1xf32>
      %62 = vector.shape_cast %61 : vector<1xf32> to vector<1x1x1xf32>
      %63 = vector.extract %62[0, 0, 0] : f32 from vector<1x1x1xf32>
      %c4 = arith.constant 4 : index
      %64 = memref.load %arg18[%c4] : memref<10xf32, #tpu.memory_space<smem>>
      memref.store %63, %arg18[%c4] : memref<10xf32, #tpu.memory_space<smem>>
      %c0_36 = arith.constant 0 : index
      %c0_37 = arith.constant 0 : index
      %65 = vector.load %arg11[%c0_36, %c0_37] : memref<2x16xf32, #tpu.memory_space<vmem>>, vector<2x16xf32>
      %c0_38 = arith.constant 0 : index
      %c0_39 = arith.constant 0 : index
      %66 = vector.load %arg9[%c0_38, %c0_39] : memref<2x16xf32, #tpu.memory_space<vmem>>, vector<2x16xf32>
      %c0_40 = arith.constant 0 : index
      %c0_41 = arith.constant 0 : index
      %67 = vector.load %arg10[%c0_40, %c0_41] : memref<2x16xf32, #tpu.memory_space<vmem>>, vector<2x16xf32>
      %68 = arith.subf %66, %67 : vector<2x16xf32>
      %69 = arith.mulf %68, %68 : vector<2x16xf32>
      %70 = arith.mulf %69, %65 : vector<2x16xf32>
      %71 = vector.shape_cast %70 : vector<2x16xf32> to vector<1x2x16xf32>
      %cst_42 = arith.constant dense<0.000000e+00> : vector<1xf32>
      %72 = vector.multi_reduction <add>, %71, %cst_42 [1, 2] : vector<1x2x16xf32> to vector<1xf32>
      %73 = vector.shape_cast %72 : vector<1xf32> to vector<1x1x1xf32>
      %74 = vector.extract %73[0, 0, 0] : f32 from vector<1x1x1xf32>
      %c5 = arith.constant 5 : index
      %75 = memref.load %arg18[%c5] : memref<10xf32, #tpu.memory_space<smem>>
      memref.store %74, %arg18[%c5] : memref<10xf32, #tpu.memory_space<smem>>
      %76 = vector.shape_cast %65 : vector<2x16xf32> to vector<1x2x16xf32>
      %cst_43 = arith.constant dense<0.000000e+00> : vector<1xf32>
      %77 = vector.multi_reduction <add>, %76, %cst_43 [1, 2] : vector<1x2x16xf32> to vector<1xf32>
      %78 = vector.shape_cast %77 : vector<1xf32> to vector<1x1x1xf32>
      %79 = vector.extract %78[0, 0, 0] : f32 from vector<1x1x1xf32>
      %c6 = arith.constant 6 : index
      %80 = memref.load %arg18[%c6] : memref<10xf32, #tpu.memory_space<smem>>
      memref.store %79, %arg18[%c6] : memref<10xf32, #tpu.memory_space<smem>>
      %c0_44 = arith.constant 0 : index
      %c0_45 = arith.constant 0 : index
      %81 = vector.load %arg14[%c0_44, %c0_45] : memref<2x8xf32, #tpu.memory_space<vmem>>, vector<2x8xf32>
      %c0_46 = arith.constant 0 : index
      %c0_47 = arith.constant 0 : index
      %82 = vector.load %arg13[%c0_46, %c0_47] : memref<2x8xi32, #tpu.memory_space<vmem>>, vector<2x8xi32>
      %83 = arith.sitofp %82 : vector<2x8xi32> to vector<2x8xf32>
      %cst_48 = arith.constant 1.000000e+00 : f32
      %84 = vector.broadcast %cst_48 : f32 to vector<2x8xf32>
      %85 = arith.addf %83, %84 : vector<2x8xf32>
      %86 = math.log %85 : vector<2x8xf32>
      %c0_49 = arith.constant 0 : index
      %c0_50 = arith.constant 0 : index
      %87 = vector.load %arg12[%c0_49, %c0_50] : memref<2x8xf32, #tpu.memory_space<vmem>>, vector<2x8xf32>
      %88 = arith.subf %87, %86 : vector<2x8xf32>
      %89 = arith.mulf %88, %88 : vector<2x8xf32>
      %90 = arith.mulf %89, %81 : vector<2x8xf32>
      %91 = vector.shape_cast %90 : vector<2x8xf32> to vector<1x2x8xf32>
      %cst_51 = arith.constant dense<0.000000e+00> : vector<1xf32>
      %92 = vector.multi_reduction <add>, %91, %cst_51 [1, 2] : vector<1x2x8xf32> to vector<1xf32>
      %93 = vector.shape_cast %92 : vector<1xf32> to vector<1x1x1xf32>
      %94 = vector.extract %93[0, 0, 0] : f32 from vector<1x1x1xf32>
      %c7 = arith.constant 7 : index
      %95 = memref.load %arg18[%c7] : memref<10xf32, #tpu.memory_space<smem>>
      memref.store %94, %arg18[%c7] : memref<10xf32, #tpu.memory_space<smem>>
      %96 = vector.shape_cast %81 : vector<2x8xf32> to vector<1x2x8xf32>
      %cst_52 = arith.constant dense<0.000000e+00> : vector<1xf32>
      %97 = vector.multi_reduction <add>, %96, %cst_52 [1, 2] : vector<1x2x8xf32> to vector<1xf32>
      %98 = vector.shape_cast %97 : vector<1xf32> to vector<1x1x1xf32>
      %99 = vector.extract %98[0, 0, 0] : f32 from vector<1x1x1xf32>
      %c8 = arith.constant 8 : index
      %100 = memref.load %arg18[%c8] : memref<10xf32, #tpu.memory_space<smem>>
      memref.store %99, %arg18[%c8] : memref<10xf32, #tpu.memory_space<smem>>
      %c0_53 = arith.constant 0 : index
      %c0_54 = arith.constant 0 : index
      %101 = vector.load %arg15[%c0_53, %c0_54] : memref<2x16xf32, #tpu.memory_space<vmem>>, vector<2x16xf32>
      %c0_55 = arith.constant 0 : index
      %c0_56 = arith.constant 0 : index
      %102 = vector.load %arg16[%c0_55, %c0_56] : memref<2x16xf32, #tpu.memory_space<vmem>>, vector<2x16xf32>
      %cst_57 = arith.constant 1.000000e+00 : f32
      %103 = vector.broadcast %cst_57 : f32 to vector<2x16xf32>
      %104 = arith.addf %103, %102 : vector<2x16xf32>
      %105 = arith.mulf %101, %101 : vector<2x16xf32>
      %106 = arith.subf %104, %105 : vector<2x16xf32>
      %107 = math.exp %102 : vector<2x16xf32>
      %108 = arith.subf %106, %107 : vector<2x16xf32>
      %109 = vector.shape_cast %108 : vector<2x16xf32> to vector<1x2x16xf32>
      %cst_58 = arith.constant dense<0.000000e+00> : vector<1xf32>
      %110 = vector.multi_reduction <add>, %109, %cst_58 [1, 2] : vector<1x2x16xf32> to vector<1xf32>
      %111 = vector.shape_cast %110 : vector<1xf32> to vector<1x1x1xf32>
      %112 = vector.extract %111[0, 0, 0] : f32 from vector<1x1x1xf32>
      %cst_59 = arith.constant -5.000000e-01 : f32
      %113 = arith.mulf %cst_59, %112 : f32
      %c9 = arith.constant 9 : index
      %114 = memref.load %arg18[%c9] : memref<10xf32, #tpu.memory_space<smem>>
      memref.store %113, %arg18[%c9] : memref<10xf32, #tpu.memory_space<smem>>
    } else {
    }
    %c0 = arith.constant 0 : index
    %c0_1 = arith.constant 0 : index
    %3 = vector.load %arg5[%c0, %c0_1] : memref<2x16xf32, #tpu.memory_space<vmem>>, vector<2x16xf32>
    %4 = vector.shape_cast %3 : vector<2x16xf32> to vector<2x16x1xf32>
    %cst = arith.constant 0.000000e+00 : f32
    %5 = vector.broadcast %cst : f32 to vector<2x16x1xf32>
    %6 = arith.cmpf ogt, %4, %5 : vector<2x16x1xf32>
    %c0_2 = arith.constant 0 : index
    %c0_3 = arith.constant 0 : index
    %c0_4 = arith.constant 0 : index
    %7 = vector.load %arg4[%c0_2, %c0_3, %c0_4] : memref<2x16x32xf32, #tpu.memory_space<vmem>>, vector<2x16x32xf32>
    %c0_5 = arith.constant 0 : index
    %c0_6 = arith.constant 0 : index
    %c0_7 = arith.constant 0 : index
    %8 = vector.load %arg2[%c0_5, %c0_6, %c0_7] : memref<2x16x32xf32, #tpu.memory_space<vmem>>, vector<2x16x32xf32>
    %9 = arith.subf %8, %7 : vector<2x16x32xf32>
    %10 = math.absf %9 : vector<2x16x32xf32>
    %cst_8 = arith.constant 0.000000e+00 : f32
    %11 = vector.shape_cast %6 : vector<2x16x1xi1> to vector<2x16x1xi1>
    %12 = vector.broadcast %11 : vector<2x16x1xi1> to vector<2x16x32xi1>
    %13 = vector.broadcast %cst_8 : f32 to vector<2x16x32xf32>
    %14 = arith.select %12, %10, %13 : vector<2x16x32xi1>, vector<2x16x32xf32>
    %c0_9 = arith.constant 0 : index
    %c0_10 = arith.constant 0 : index
    %c0_11 = arith.constant 0 : index
    %15 = vector.load %arg3[%c0_9, %c0_10, %c0_11] : memref<2x16x32xf32, #tpu.memory_space<vmem>>, vector<2x16x32xf32>
    %16 = arith.subf %15, %7 : vector<2x16x32xf32>
    %17 = math.absf %16 : vector<2x16x32xf32>
    %cst_12 = arith.constant 0.000000e+00 : f32
    %18 = vector.shape_cast %6 : vector<2x16x1xi1> to vector<2x16x1xi1>
    %19 = vector.broadcast %18 : vector<2x16x1xi1> to vector<2x16x32xi1>
    %20 = vector.broadcast %cst_12 : f32 to vector<2x16x32xf32>
    %21 = arith.select %19, %17, %20 : vector<2x16x32xi1>, vector<2x16x32xf32>
    %c0_13 = arith.constant 0 : index
    %22 = memref.load %arg18[%c0_13] : memref<10xf32, #tpu.memory_space<smem>>
    %23 = vector.shape_cast %14 : vector<2x16x32xf32> to vector<1x2x16x32xf32>
    %cst_14 = arith.constant dense<0.000000e+00> : vector<1xf32>
    %24 = vector.multi_reduction <add>, %23, %cst_14 [1, 2, 3] : vector<1x2x16x32xf32> to vector<1xf32>
    %25 = vector.shape_cast %24 : vector<1xf32> to vector<1x1x1x1xf32>
    %26 = vector.extract %25[0, 0, 0, 0] : f32 from vector<1x1x1x1xf32>
    %27 = arith.addf %22, %26 : f32
    %c0_15 = arith.constant 0 : index
    %28 = memref.load %arg18[%c0_15] : memref<10xf32, #tpu.memory_space<smem>>
    memref.store %27, %arg18[%c0_15] : memref<10xf32, #tpu.memory_space<smem>>
    %c1 = arith.constant 1 : index
    %29 = memref.load %arg18[%c1] : memref<10xf32, #tpu.memory_space<smem>>
    %30 = vector.shape_cast %21 : vector<2x16x32xf32> to vector<1x2x16x32xf32>
    %cst_16 = arith.constant dense<0.000000e+00> : vector<1xf32>
    %31 = vector.multi_reduction <add>, %30, %cst_16 [1, 2, 3] : vector<1x2x16x32xf32> to vector<1xf32>
    %32 = vector.shape_cast %31 : vector<1xf32> to vector<1x1x1x1xf32>
    %33 = vector.extract %32[0, 0, 0, 0] : f32 from vector<1x1x1x1xf32>
    %34 = arith.addf %29, %33 : f32
    %c1_17 = arith.constant 1 : index
    %35 = memref.load %arg18[%c1_17] : memref<10xf32, #tpu.memory_space<smem>>
    memref.store %34, %arg18[%c1_17] : memref<10xf32, #tpu.memory_space<smem>>
    %c2 = arith.constant 2 : index
    %36 = memref.load %arg18[%c2] : memref<10xf32, #tpu.memory_space<smem>>
    %37 = vector.shape_cast %3 : vector<2x16xf32> to vector<1x2x16xf32>
    %cst_18 = arith.constant dense<0.000000e+00> : vector<1xf32>
    %38 = vector.multi_reduction <add>, %37, %cst_18 [1, 2] : vector<1x2x16xf32> to vector<1xf32>
    %39 = vector.shape_cast %38 : vector<1xf32> to vector<1x1x1xf32>
    %40 = vector.extract %39[0, 0, 0] : f32 from vector<1x1x1xf32>
    %41 = arith.addf %36, %40 : f32
    %c2_19 = arith.constant 2 : index
    %42 = memref.load %arg18[%c2_19] : memref<10xf32, #tpu.memory_space<smem>>
    memref.store %41, %arg18[%c2_19] : memref<10xf32, #tpu.memory_space<smem>>
    %c0_i32_20 = arith.constant 0 : i32
    %43 = arith.cmpi eq, %arg1, %c0_i32_20 : i32
    %44 = arith.extui %43 : i1 to i32
    %c0_i32_21 = arith.constant 0 : i32
    %45 = arith.cmpi ne, %44, %c0_i32_21 : i32
    scf.if %45 {
      %c0_22 = arith.constant 0 : index
      %46 = memref.load %arg18[%c0_22] : memref<10xf32, #tpu.memory_space<smem>>
      %c0_23 = arith.constant 0 : index
      %c0_24 = arith.constant 0 : index
      %47 = memref.load %arg17[%c0_23, %c0_24] : memref<1x10xf32, #tpu.memory_space<smem>>
      memref.store %46, %arg17[%c0_23, %c0_24] : memref<1x10xf32, #tpu.memory_space<smem>>
      %c1_25 = arith.constant 1 : index
      %48 = memref.load %arg18[%c1_25] : memref<10xf32, #tpu.memory_space<smem>>
      %c0_26 = arith.constant 0 : index
      %c1_27 = arith.constant 1 : index
      %49 = memref.load %arg17[%c0_26, %c1_27] : memref<1x10xf32, #tpu.memory_space<smem>>
      memref.store %48, %arg17[%c0_26, %c1_27] : memref<1x10xf32, #tpu.memory_space<smem>>
      %c2_28 = arith.constant 2 : index
      %50 = memref.load %arg18[%c2_28] : memref<10xf32, #tpu.memory_space<smem>>
      %c0_29 = arith.constant 0 : index
      %c2_30 = arith.constant 2 : index
      %51 = memref.load %arg17[%c0_29, %c2_30] : memref<1x10xf32, #tpu.memory_space<smem>>
      memref.store %50, %arg17[%c0_29, %c2_30] : memref<1x10xf32, #tpu.memory_space<smem>>
      %c3 = arith.constant 3 : index
      %52 = memref.load %arg18[%c3] : memref<10xf32, #tpu.memory_space<smem>>
      %c0_31 = arith.constant 0 : index
      %c3_32 = arith.constant 3 : index
      %53 = memref.load %arg17[%c0_31, %c3_32] : memref<1x10xf32, #tpu.memory_space<smem>>
      memref.store %52, %arg17[%c0_31, %c3_32] : memref<1x10xf32, #tpu.memory_space<smem>>
      %c4 = arith.constant 4 : index
      %54 = memref.load %arg18[%c4] : memref<10xf32, #tpu.memory_space<smem>>
      %c0_33 = arith.constant 0 : index
      %c4_34 = arith.constant 4 : index
      %55 = memref.load %arg17[%c0_33, %c4_34] : memref<1x10xf32, #tpu.memory_space<smem>>
      memref.store %54, %arg17[%c0_33, %c4_34] : memref<1x10xf32, #tpu.memory_space<smem>>
      %c5 = arith.constant 5 : index
      %56 = memref.load %arg18[%c5] : memref<10xf32, #tpu.memory_space<smem>>
      %c0_35 = arith.constant 0 : index
      %c5_36 = arith.constant 5 : index
      %57 = memref.load %arg17[%c0_35, %c5_36] : memref<1x10xf32, #tpu.memory_space<smem>>
      memref.store %56, %arg17[%c0_35, %c5_36] : memref<1x10xf32, #tpu.memory_space<smem>>
      %c6 = arith.constant 6 : index
      %58 = memref.load %arg18[%c6] : memref<10xf32, #tpu.memory_space<smem>>
      %c0_37 = arith.constant 0 : index
      %c6_38 = arith.constant 6 : index
      %59 = memref.load %arg17[%c0_37, %c6_38] : memref<1x10xf32, #tpu.memory_space<smem>>
      memref.store %58, %arg17[%c0_37, %c6_38] : memref<1x10xf32, #tpu.memory_space<smem>>
      %c7 = arith.constant 7 : index
      %60 = memref.load %arg18[%c7] : memref<10xf32, #tpu.memory_space<smem>>
      %c0_39 = arith.constant 0 : index
      %c7_40 = arith.constant 7 : index
      %61 = memref.load %arg17[%c0_39, %c7_40] : memref<1x10xf32, #tpu.memory_space<smem>>
      memref.store %60, %arg17[%c0_39, %c7_40] : memref<1x10xf32, #tpu.memory_space<smem>>
      %c8 = arith.constant 8 : index
      %62 = memref.load %arg18[%c8] : memref<10xf32, #tpu.memory_space<smem>>
      %c0_41 = arith.constant 0 : index
      %c8_42 = arith.constant 8 : index
      %63 = memref.load %arg17[%c0_41, %c8_42] : memref<1x10xf32, #tpu.memory_space<smem>>
      memref.store %62, %arg17[%c0_41, %c8_42] : memref<1x10xf32, #tpu.memory_space<smem>>
      %c9 = arith.constant 9 : index
      %64 = memref.load %arg18[%c9] : memref<10xf32, #tpu.memory_space<smem>>
      %c0_43 = arith.constant 0 : index
      %c9_44 = arith.constant 9 : index
      %65 = memref.load %arg17[%c0_43, %c9_44] : memref<1x10xf32, #tpu.memory_space<smem>>
      memref.store %64, %arg17[%c0_43, %c9_44] : memref<1x10xf32, #tpu.memory_space<smem>>
    } else {
    }
    return
  }
  func.func @transform_0(%arg0: i32, %arg1: i32) -> (i32, i32, i32) {
    %c0_i32 = arith.constant 0 : i32
    %c0_i32_0 = arith.constant 0 : i32
    return %arg0, %arg1, %c0_i32 : i32, i32, i32
  }
  func.func @transform_1(%arg0: i32, %arg1: i32) -> (i32, i32, i32) {
    %c0_i32 = arith.constant 0 : i32
    %c0_i32_0 = arith.constant 0 : i32
    return %arg0, %arg1, %c0_i32 : i32, i32, i32
  }
  func.func @transform_2(%arg0: i32, %arg1: i32) -> (i32, i32, i32) {
    %c0_i32 = arith.constant 0 : i32
    %c0_i32_0 = arith.constant 0 : i32
    return %arg0, %arg1, %c0_i32 : i32, i32, i32
  }
  func.func @transform_3(%arg0: i32, %arg1: i32) -> (i32, i32) {
    %c0_i32 = arith.constant 0 : i32
    return %arg0, %arg1 : i32, i32
  }
  func.func @transform_4(%arg0: i32, %arg1: i32) -> (i32, i32) {
    %c0_i32 = arith.constant 0 : i32
    %c0_i32_0 = arith.constant 0 : i32
    return %arg0, %c0_i32 : i32, i32
  }
  func.func @transform_5(%arg0: i32, %arg1: i32) -> (i32, i32) {
    %c0_i32 = arith.constant 0 : i32
    %c0_i32_0 = arith.constant 0 : i32
    return %arg0, %c0_i32 : i32, i32
  }
  func.func @transform_6(%arg0: i32, %arg1: i32) -> (i32, i32) {
    %c0_i32 = arith.constant 0 : i32
    %c0_i32_0 = arith.constant 0 : i32
    return %arg0, %c0_i32 : i32, i32
  }
  func.func @transform_7(%arg0: i32, %arg1: i32) -> (i32, i32) {
    %c0_i32 = arith.constant 0 : i32
    %c0_i32_0 = arith.constant 0 : i32
    return %arg0, %c0_i32 : i32, i32
  }
  func.func @transform_8(%arg0: i32, %arg1: i32) -> (i32, i32) {
    %c0_i32 = arith.constant 0 : i32
    %c0_i32_0 = arith.constant 0 : i32
    return %arg0, %c0_i32 : i32, i32
  }
  func.func @transform_9(%arg0: i32, %arg1: i32) -> (i32, i32) {
    %c0_i32 = arith.constant 0 : i32
    %c0_i32_0 = arith.constant 0 : i32
    return %arg0, %c0_i32 : i32, i32
  }
  func.func @transform_10(%arg0: i32, %arg1: i32) -> (i32, i32) {
    %c0_i32 = arith.constant 0 : i32
    %c0_i32_0 = arith.constant 0 : i32
    return %arg0, %c0_i32 : i32, i32
  }
  func.func @transform_11(%arg0: i32, %arg1: i32) -> (i32, i32) {
    %c0_i32 = arith.constant 0 : i32
    %c0_i32_0 = arith.constant 0 : i32
    return %arg0, %c0_i32 : i32, i32
  }
  func.func @transform_12(%arg0: i32, %arg1: i32) -> (i32, i32) {
    %c0_i32 = arith.constant 0 : i32
    %c0_i32_0 = arith.constant 0 : i32
    return %arg0, %c0_i32 : i32, i32
  }
  func.func @transform_13(%arg0: i32, %arg1: i32) -> (i32, i32) {
    %c0_i32 = arith.constant 0 : i32
    %c0_i32_0 = arith.constant 0 : i32
    return %arg0, %c0_i32 : i32, i32
  }
  func.func @transform_14(%arg0: i32, %arg1: i32) -> (i32, i32) {
    %c0_i32 = arith.constant 0 : i32
    %c0_i32_0 = arith.constant 0 : i32
    return %arg0, %c0_i32 : i32, i32
  }
  func.func @transform_15(%arg0: i32, %arg1: i32) -> (i32, i32) {
    %c0_i32 = arith.constant 0 : i32
    %c0_i32_0 = arith.constant 0 : i32
    return %arg0, %c0_i32 : i32, i32
  }
}

</mosaic_0001>

<bundles_post_ra>
// kernel: tpu_custom_call.1
= control target key start
LH: loop header
LB: loop body
LE: loop exit
PB: predicated region body
PF: predicated region fallthrough
CT: control target
= control target key end

     0   :  { %20 = vsyncpa [#allocation4], 0  ;;  %s662_s0 = inlined_call_operand.hbm [shape: f32[2,16,32], index: 0, kind: input, shape index: {}]   ;;  %s663_s1 = inlined_call_operand.hbm [shape: f32[2,16,32], index: 1, kind: input, shape index: {}]   ;;  %s664_s2 = inlined_call_operand.hbm [shape: f32[2,16,32], index: 2, kind: input, shape index: {}]   ;;  %s665_s3 = inlined_call_operand.vmem [shape: f32[2,16], index: 3, kind: input, shape index: {}]   ;;  %s666_s4 = inlined_call_operand.vmem [shape: f32[2,8], index: 4, kind: input, shape index: {}]   ;;  %s667_s5 = inlined_call_operand.vmem [shape: f32[2,8], index: 5, kind: input, shape index: {}]   ;;  %s668_s6 = inlined_call_operand.vmem [shape: f32[2,8], index: 6, kind: input, shape index: {}]   ;;  %s669_s7 = inlined_call_operand.vmem [shape: f32[2,16], index: 7, kind: input, shape index: {}]   ;;  %s670_s8 = inlined_call_operand.vmem [shape: f32[2,16], index: 8, kind: input, shape index: {}]   ;;  %s671_s9 = inlined_call_operand.vmem [shape: f32[2,16], index: 9, kind: input, shape index: {}]   ;;  %s672_s10 = inlined_call_operand.vmem [shape: f32[2,8], index: 10, kind: input, shape index: {}]   ;;  %s673_s11 = inlined_call_operand.vmem [shape: s32[2,8], index: 11, kind: input, shape index: {}]   ;;  %s674_s12 = inlined_call_operand.vmem [shape: f32[2,8], index: 12, kind: input, shape index: {}]   ;;  %s675_s13 = inlined_call_operand.vmem [shape: f32[2,16], index: 13, kind: input, shape index: {}]   ;;  %s676_s14 = inlined_call_operand.vmem [shape: f32[2,16], index: 14, kind: input, shape index: {}]   ;;  %s677_s15 = inlined_call_operand.hbm [shape: f32[1,10], index: 15, kind: output, shape index: {}]  }
   0x1   :  { %21 = vsyncpa [#allocation7], 0 }
   0x2   :  { %22 = vsyncpa [#allocation5], 0  ;;  %s509_s18 = smov [#allocation6]   ;;  %s510_s20 = smov [#allocation3]  }
   0x3   :  { %s40_s19 = sshll.u32 %s509_s18, 4  ;;  %s28_s21 = sshll.u32 %s510_s20, 4  ;;  %s41_s19 = int_to_ptr.vmem [resolvable:$true] %s40_s19  ;;  %s29_s21 = int_to_ptr.vmem [resolvable:$true] %s28_s21 }
   0x4   :  { %s443_s22 = scalar_lea.vmem %s41_s19, 512  ;;  %p448_p1 = scmp.lt.s32.totalorder %s41_s19, %s41_s19 }
   0x5   :  { %p444_p0 = scmp.ne.s32.totalorder %s41_s19, %s443_s22  ;;  %p449_p2 = scmp.lt.s32.totalorder %s443_s22, %s443_s22 }
   0x7   :  { %p450_p3 = por %p449_p2, %p448_p1 }
   0x9   :  { %p451_p4 = pnand %p450_p3, %p444_p0 }
   0xb   :  { %454 = shalt.err (!%p451_p4)
}
   0xc   :  { %s511_s23 = smov 128   ;;  %s512_s24 = smov 8  }
   0xd   :  { %46 = dma.hbm_to_vmem [thread:$0]  %s663_s1, 512, %s41_s19, [#allocation7], %s511_s23, %s511_s23, %s512_s24  }
   0xe   :  { %s463_s27 = scalar_lea.vmem %s29_s21, 512  ;;  %p468_p6 = scmp.lt.s32.totalorder %s29_s21, %s29_s21 }
   0xf   :  { %p464_p5 = scmp.ne.s32.totalorder %s29_s21, %s463_s27  ;;  %p469_p7 = scmp.lt.s32.totalorder %s463_s27, %s463_s27 }
  0x11   :  { %p470_p8 = por %p469_p7, %p468_p6 }
  0x13   :  { %p471_p9 = pnand %p470_p8, %p464_p5 }
  0x15   :  { %474 = shalt.err (!%p471_p9)
}
  0x16   :  { %34 = dma.hbm_to_vmem [thread:$0]  %s662_s0, 512, %s29_s21, [#allocation4], %s511_s23, %s511_s23, %s512_s24  }
  0x17   :  { %s513_s30 = smov [#allocation8]  }
  0x18   :  { %s52_s16 = sshll.u32 %s513_s30, 4  ;;  %s53_s16 = int_to_ptr.vmem [resolvable:$true] %s52_s16 }
  0x19   :  { %s483_s17 = scalar_lea.vmem %s53_s16, 512  ;;  %p488_p11 = scmp.lt.s32.totalorder %s53_s16, %s53_s16 }
  0x1a   :  { %p484_p10 = scmp.ne.s32.totalorder %s53_s16, %s483_s17  ;;  %p489_p12 = scmp.lt.s32.totalorder %s483_s17, %s483_s17 }
  0x1c   :  { %p490_p13 = por %p489_p12, %p488_p11 }
  0x1e   :  { %p491_p0 = pnand %p490_p13, %p484_p10 }
  0x20   :  { %494 = shalt.err (!%p491_p0)
}
  0x21   :  { %58 = dma.hbm_to_vmem [thread:$0]  %s664_s2, 512, %s53_s16, [#allocation7], %s511_s23, %s511_s23, %s512_s24  }
  0x22   :  { %503 = dma.done.wait [#allocation4], 512  }
  0x23   :  { %504 = vsyncadd [#allocation4], 4294966784 }
  0x24   :  { %505 = dma.done.wait [#allocation7], 1024  }
  0x25   :  { %506 = vsyncadd [#allocation7], 4294966272  ;;  %v220_v0 = vlaneseq  ;;  %v219_v4 = vld [vmem:[%s665_s3] sm:$0x3]  ;;  %vm139_vm0 = vcmask 123904   ;;  %vm108_vm1 = vcmask 58368  }
  0x26   :  { %v608_v7 = vsel %vm139_vm0, %v219_v4, 0.0  ;;  %v165_v8 = vld [vmem:[%s673_s11] sm:$0x3]  ;;  %v248_v48 = vld [vmem:[#allocation8 + $0x10] sm:$0xff]  ;;  %v247_v51 = vld [vmem:[#allocation8 + $0x8] sm:$0xff]  ;;  %vm291_vm4 = vcmask 261120  }
  0x27   :  { %v221_v1 = vshrl.u32 %v220_v0, 7  ;;  %v166_v9 = vcvt.s32.f32 %v165_v8  ;;  %v103_v11 = vld [vmem:[%s666_s4] sm:$0x3]  ;;  %v252_v49 = vld [vmem:[#allocation3 + $0x10] sm:$0xff]  ;;  %v251_v52 = vld [vmem:[#allocation3 + $0x8] sm:$0xff]  ;;  %s514_s22 = smov [#allocation9]  }
  0x28   :  { %v104_v12 = vld [vmem:[%s667_s5] sm:$0x3]  ;;  %v276_v50 = vld [vmem:[#allocation6 + $0x10] sm:$0xff]  ;;  %v275_v53 = vld [vmem:[#allocation6 + $0x8] sm:$0xff]  ;;  %v256_v59 = vsub.f32 %v252_v49, %v248_v48  ;;  %v255_v61 = vsub.f32 %v251_v52, %v247_v51 }
  0x29   :  { %v222_v2 = vsub.s32 0, %v221_v1  ;;  %v233_v3 = vsub.s32 1, %v221_v1  ;;  %v167_v10 = vadd.f32 1.0, %v166_v9  ;;  %v199_v13 = vld [vmem:[%s676_s14] sm:$0x3]  ;;  %v105_v14 = vsub.f32 %v103_v11, %v104_v12  ;;  %v249_v55 = vld [vmem:[#allocation8 + $0x18] sm:$0xff] }
  0x2a   :  { %v134_v15 = vld [vmem:[%s669_s7] sm:$0x3]  ;;  %v203_v17 = vmul.f32 1.442695, %v199_v13  ;;  %v200_v32 = vadd.f32 1.0, %v199_v13  ;;  %v253_v56 = vld [vmem:[#allocation3 + $0x18] sm:$0xff]  ;;  %v280_v60 = vsub.f32 %v276_v50, %v248_v48  ;;  %v279_v62 = vsub.f32 %v275_v53, %v247_v51 }
  0x2b   :  { %v223_v5 = vrot.slane %v219_v4, %v222_v2  ;;  %v234_v6 = vrot.slane %v219_v4, %v233_v3  ;;  %431 = vlog2.f32 %v167_v10  ;;  %v135_v16 = vld [vmem:[%s670_s8] sm:$0x3]  ;;  %v106_v19 = vmul.f32 %v105_v14, %v105_v14  ;;  %v277_v57 = vld [vmem:[#allocation6 + $0x18] sm:$0xff] }
  0x2c   :  { %v136_v20 = vsub.f32 %v134_v15, %v135_v16  ;;  %v102_v21 = vld [vmem:[%s668_s6] sm:$0x3]  ;;  %433 = vpow2.f32 %v203_v17  ;;  %v257_v63 = vsub.f32 %v253_v56, %v249_v55  ;;  %v281_v0 = vsub.f32 %v277_v57, %v249_v55 }
  0x2d   :  { %225 = vbcast.lane.b32.xlu0 %v223_v5, 256  ;;  %236 = vbcast.lane.b32.xlu1 %v234_v6, 256  ;;  %v170_v23 = vld [vmem:[%s672_s10] sm:$0x3]  ;;  %v107_v24 = vmul.f32 %v106_v19, %v102_v21  ;;  %v121_v36 = vsel %vm108_vm1, %v102_v21, 0.0 }
  0x2e   :  { %v137_v25 = vmul.f32 %v136_v20, %v136_v20  ;;  %v133_v26 = vld [vmem:[%s671_s9] sm:$0x3]  ;;  %v260_v4 = vand.u32 2147483647, %v256_v59  ;;  %v259_v8 = vand.u32 2147483647, %v255_v61 }
  0x2f   :  { %v198_v28 = vld [vmem:[%s675_s13] sm:$0x3]  ;;  %v109_v29 = vsel %vm108_vm1, %v107_v24, 0.0  ;;  %v152_v40 = vsel %vm139_vm0, %v133_v26, 0.0  ;;  %v283_v9 = vand.u32 2147483647, %v279_v62 }
  0x30   :  { %v138_v30 = vmul.f32 %v137_v25, %v133_v26  ;;  %v201_v33 = vmul.f32 %v198_v28, %v198_v28  ;;  %v164_v34 = vld [vmem:[%s674_s12] sm:$0x3]  ;;  %v261_v10 = vand.u32 2147483647, %v257_v63  ;;  %v285_v11 = vand.u32 2147483647, %v281_v0 }
  0x31   :  { %229 = vbcast.lane.b32.xlu0 %v223_v5, 264  ;;  %240 = vbcast.lane.b32.xlu1 %v234_v6, 264  ;;  %v186_v43 = vsel %vm108_vm1, %v164_v34, 0.0  ;;  %v246_v45 = vld [vmem:[#allocation8] sm:$0xff]  ;;  %v284_v5 = vand.u32 2147483647, %v280_v60 }
  0x32   :  { %v140_v35 = vsel %vm139_vm0, %v138_v30, 0.0  ;;  %v202_v38 = vsub.f32 %v200_v32, %v201_v33  ;;  %v250_v46 = vld [vmem:[#allocation3] sm:$0xff] }
  0x33   :  { %v274_v47 = vld [vmem:[#allocation6] sm:$0xff]  ;;  %v254_v54 = vsub.f32 %v250_v46, %v246_v45 }
  0x34   :  { %v278_v58 = vsub.f32 %v274_v47, %v246_v45 }
  0x35   :  { %v258_v1 = vand.u32 2147483647, %v254_v54 }
  0x36   :  { %v282_v2 = vand.u32 2147483647, %v278_v58 }
  0x38   :  { %v432_v18 = vpop.eup %431 }
  0x39   :  { %v169_v22 = vmul.f32 0.6931472, %v432_v18  ;;  %v434_v39 = vpop.eup %433 }
  0x3a   :  { %v205_v42 = vsub.f32 %v202_v38, %v434_v39 }
  0x3b   :  { %v171_v27 = vsub.f32 %v170_v23, %v169_v22 }
  0x3c   :  { %v206_v44 = vsel %vm139_vm0, %v205_v42, 0.0 }
  0x3d   :  { %v172_v31 = vmul.f32 %v171_v27, %v171_v27 }
  0x3f   :  { %v173_v37 = vmul.f32 %v172_v31, %v164_v34 }
  0x41   :  { %v174_v41 = vsel %vm108_vm1, %v173_v37, 0.0 }
  0x50   :  { %110 = vadd.xlane.f32.xlu0 %v109_v29 }
  0x54   :  { %141 = vadd.xlane.f32.xlu0 %v140_v35 }
  0x55   :  { %122 = vadd.xlane.f32.xlu1 %v121_v36 }
  0x58   :  { %153 = vadd.xlane.f32.xlu0 %v152_v40 }
  0x59   :  { %175 = vadd.xlane.f32.xlu1 %v174_v41 }
  0x5c   :  { %187 = vadd.xlane.f32.xlu0 %v186_v43 }
  0x5d   :  { %207 = vadd.xlane.f32.xlu1 %v206_v44 }
  0x9f   :  { %v226_v3 = vpop.permute.xlu0 %225  ;;  %v237_v6 = vpop.permute.xlu1 %236 }
  0xa0   :  { %vm242_vm2 = vcmp.gt.f32.partialorder %v226_v3, 0.0  ;;  %vm244_vm3 = vcmp.gt.f32.partialorder %v237_v6, 0.0 }
  0xa1   :  { %v270_v12 = vsel %vm242_vm2, %v258_v1, 0.0  ;;  %v286_v13 = vsel %vm242_vm2, %v282_v2, 0.0  ;;  %v272_v16 = vsel %vm244_vm3, %v260_v4, 0.0  ;;  %v288_v17 = vsel %vm244_vm3, %v284_v5, 0.0 }
  0xa2   :  { %v292_v22 = vsel %vm291_vm4, %v270_v12, 0.0  ;;  %v312_v23 = vsel %vm291_vm4, %v286_v13, 0.0  ;;  %v295_v28 = vsel %vm291_vm4, %v272_v16, 0.0  ;;  %v315_v29 = vsel %vm291_vm4, %v288_v17, 0.0 }
  0xa3   :  { %v230_v14 = vpop.permute.xlu0 %229  ;;  %v241_v15 = vpop.permute.xlu1 %240 }
  0xa4   :  { %vm243_vm5 = vcmp.gt.f32.partialorder %v230_v14, 0.0  ;;  %vm245_vm6 = vcmp.gt.f32.partialorder %v241_v15, 0.0 }
  0xa5   :  { %v271_v18 = vsel %vm243_vm5, %v259_v8, 0.0  ;;  %v287_v19 = vsel %vm243_vm5, %v283_v9, 0.0  ;;  %v273_v20 = vsel %vm245_vm6, %v261_v10, 0.0  ;;  %v289_v21 = vsel %vm245_vm6, %v285_v11, 0.0 }
  0xa6   :  { %v293_v24 = vsel %vm291_vm4, %v271_v18, 0.0  ;;  %v313_v25 = vsel %vm291_vm4, %v287_v19, 0.0  ;;  %v317_v30 = vsel %vm291_vm4, %v289_v21, 0.0  ;;  %v297_v31 = vsel %vm291_vm4, %v273_v20, 0.0 }
  0xa7   :  { %v294_v26 = vadd.f32 %v293_v24, %v292_v22  ;;  %v314_v27 = vadd.f32 %v313_v25, %v312_v23 }
  0xa9   :  { %v316_v32 = vadd.f32 %v315_v29, %v314_v27  ;;  %v296_v33 = vadd.f32 %v295_v28, %v294_v26 }
  0xab   :  { %v318_v34 = vadd.f32 %v317_v30, %v316_v32  ;;  %v298_v35 = vadd.f32 %v297_v31, %v296_v33 }
  0xad   :  { %319 = vadd.xlane.f32.xlu1 %v318_v34  ;;  %299 = vadd.xlane.f32.xlu0 %v298_v35 }
  0xb1   :  { %334 = vadd.xlane.f32.xlu0 %v608_v7 }
  0xd9   :  { %v111_v36 = vpop.xlane.xlu0 %110 }
  0xda   :  { %v112_v37 = vrot.slane %v111_v36, 4 }
  0xdc   :  { %v113_v38 = vadd.f32 %v112_v37, %v111_v36 }
  0xdd   :  { %v142_v39 = vpop.xlane.xlu0 %141 }
  0xde   :  { %v114_v40 = vrot.slane %v113_v38, 2  ;;  %v123_v41 = vpop.xlane.xlu1 %122  ;;  %v143_v42 = vrot.slane %v142_v39, 4 }
  0xdf   :  { %v124_v43 = vrot.slane %v123_v41, 4 }
  0xe0   :  { %v144_v44 = vadd.f32 %v143_v42, %v142_v39  ;;  %v115_v45 = vadd.f32 %v114_v40, %v113_v38 }
  0xe1   :  { %v125_v46 = vadd.f32 %v124_v43, %v123_v41  ;;  %v154_v47 = vpop.xlane.xlu0 %153 }
  0xe2   :  { %v145_v48 = vrot.slane %v144_v44, 2  ;;  %v155_v49 = vrot.slane %v154_v47, 4  ;;  %v176_v50 = vpop.xlane.xlu1 %175  ;;  %v116_v51 = vrot.slane %v115_v45, 1 }
  0xe3   :  { %v126_v52 = vrot.slane %v125_v46, 2  ;;  %v177_v53 = vrot.slane %v176_v50, 4 }
  0xe4   :  { %v156_v54 = vadd.f32 %v155_v49, %v154_v47  ;;  %v117_v7 = vadd.f32 %v116_v51, %v115_v45  ;;  %v146_v55 = vadd.f32 %v145_v48, %v144_v44 }
  0xe5   :  { %v178_v56 = vadd.f32 %v177_v53, %v176_v50  ;;  %v188_v57 = vpop.xlane.xlu0 %187  ;;  %v127_v58 = vadd.f32 %v126_v52, %v125_v46 }
  0xe6   :  { %v157_v59 = vrot.slane %v156_v54, 2  ;;  %v189_v60 = vrot.slane %v188_v57, 4  ;;  %405 = vpush %v117_v7  ;;  %v208_v61 = vpop.xlane.xlu1 %207  ;;  %v147_v62 = vrot.slane %v146_v55, 1 }
  0xe7   :  { %v179_v63 = vrot.slane %v178_v56, 2  ;;  %v209_v0 = vrot.slane %v208_v61, 4  ;;  %v128_v1 = vrot.slane %v127_v58, 1 }
  0xe8   :  { %v190_v2 = vadd.f32 %v189_v60, %v188_v57  ;;  %v148_v3 = vadd.f32 %v147_v62, %v146_v55  ;;  %v158_v4 = vadd.f32 %v157_v59, %v156_v54 }
  0xe9   :  { %v210_v5 = vadd.f32 %v209_v0, %v208_v61  ;;  %v129_v6 = vadd.f32 %v128_v1, %v127_v58  ;;  %v180_v8 = vadd.f32 %v179_v63, %v178_v56 }
  0xea   :  { %v191_v9 = vrot.slane %v190_v2, 2  ;;  %v159_v10 = vrot.slane %v158_v4, 1 }
  0xeb   :  { %v211_v11 = vrot.slane %v210_v5, 2  ;;  %407 = vpush %v129_v6  ;;  %v181_v12 = vrot.slane %v180_v8, 1 }
  0xec   :  { %409 = vpush %v148_v3  ;;  %v160_v13 = vadd.f32 %v159_v10, %v158_v4  ;;  %v192_v14 = vadd.f32 %v191_v9, %v190_v2 }
  0xed   :  { %v182_v15 = vadd.f32 %v181_v12, %v180_v8  ;;  %v212_v16 = vadd.f32 %v211_v11, %v210_v5 }
  0xee   :  { %411 = vpush %v160_v13  ;;  %v193_v17 = vrot.slane %v192_v14, 1 }
  0xef   :  { %413 = vpush %v182_v15  ;;  %v213_v18 = vrot.slane %v212_v16, 1 }
  0xf0   :  { %v194_v19 = vadd.f32 %v193_v17, %v192_v14 }
  0xf1   :  { %v214_v20 = vadd.f32 %v213_v18, %v212_v16 }
  0xf2   :  { %415 = vpush %v194_v19 }
  0xf3   :  { %417 = vpush %v214_v20 }
 0x117   :  { %s406_s9 = spop %405 }
 0x118   :  { %360 = sst [smem:[#allocation9 + $0x3]] %s406_s9 }
 0x11c   :  { %s408_s12 = spop %407 }
 0x11d   :  { %363 = sst [smem:[#allocation9 + $0x4]] %s408_s12  ;;  %s410_s13 = spop %409 }
 0x11e   :  { %366 = sst [smem:[#allocation9 + $0x5]] %s410_s13 }
 0x11f   :  { %s412_s17 = spop %411 }
 0x120   :  { %369 = sst [smem:[#allocation9 + $0x6]] %s412_s17  ;;  %s414_s1 = spop %413 }
 0x121   :  { %372 = sst [smem:[#allocation9 + $0x7]] %s414_s1 }
 0x123   :  { %s416_s18 = spop %415 }
 0x124   :  { %375 = sst [smem:[#allocation9 + $0x8]] %s416_s18  ;;  %s418_s0 = spop %417 }
 0x125   :  { %s216_s19 = smul.f32 -0.5, %s418_s0 }
 0x127   :  { %378 = sst [smem:[#allocation9 + $0x9]] %s216_s19 }
 0x136   :  { %v320_v21 = vpop.xlane.xlu1 %319  ;;  %v300_v22 = vpop.xlane.xlu0 %299 }
 0x137   :  { %v321_v23 = vrot.slane %v320_v21, 4  ;;  %v301_v24 = vrot.slane %v300_v22, 4 }
 0x139   :  { %v322_v25 = vadd.f32 %v321_v23, %v320_v21  ;;  %v302_v26 = vadd.f32 %v301_v24, %v300_v22 }
 0x13a   :  { %v335_v27 = vpop.xlane.xlu0 %334 }
 0x13b   :  { %v323_v28 = vrot.slane %v322_v25, 2  ;;  %v303_v29 = vrot.slane %v302_v26, 2  ;;  %v336_v30 = vrot.slane %v335_v27, 4 }
 0x13d   :  { %v324_v31 = vadd.f32 %v323_v28, %v322_v25  ;;  %v337_v32 = vadd.f32 %v336_v30, %v335_v27  ;;  %v304_v33 = vadd.f32 %v303_v29, %v302_v26 }
 0x13f   :  { %v338_v34 = vrot.slane %v337_v32, 2  ;;  %v305_v35 = vrot.slane %v304_v33, 1  ;;  %v325_v36 = vrot.slane %v324_v31, 1 }
 0x141   :  { %v339_v37 = vadd.f32 %v338_v34, %v337_v32  ;;  %v306_v38 = vadd.f32 %v305_v35, %v304_v33  ;;  %v326_v39 = vadd.f32 %v325_v36, %v324_v31 }
 0x143   :  { %419 = vpush %v306_v38  ;;  %v340_v40 = vrot.slane %v339_v37, 1 }
 0x144   :  { %421 = vpush %v326_v39 }
 0x145   :  { %v341_v41 = vadd.f32 %v340_v40, %v339_v37 }
 0x147   :  { %423 = vpush %v341_v41 }
 0x174   :  { %s420_s2 = spop %419 }
 0x175   :  { %351 = sst [smem:[#allocation9]] %s420_s2  ;;  %s422_s20 = spop %421 }
 0x176   :  { %354 = sst [smem:[#allocation9 + $0x1]] %s422_s20 }
 0x178   :  { %s424_s21 = spop %423 }
 0x179   :  { %357 = sst [smem:[#allocation9 + $0x2]] %s424_s21 }
 0x17a   :  { %386 = dma.smem_to_hbm %s514_s22, 16, %s677_s15, [#allocation5]  }
 0x17b   :  { %507 = dma.done.wait [#allocation5], 16  }
 0x17c   :  { %508 = vsyncadd [#allocation5], 4294967280 }
 0x17d   :  { %390 = sfence }
 0x17e   :  { %391 = vsyncpa [#allocation4], 1 }
 0x17f   :  { %392 = vsyncpa [#allocation7], 1 }
 0x180   :  { %393 = vsyncpa [#allocation5], 1 }

</bundles_post_ra>
